<compile_context>
chip_gen: v6e
topology: v6e:2x2x1
jax: 0.10.0
libtpu: 0.0.40
codegen_flags: <defaults>
</compile_context>

<pallas_src>
import functools

import jax
import jax.numpy as jnp
from jax.experimental import pallas as pl
from jax.experimental.pallas import tpu as pltpu


# --------------------------------------------------------------------------- #
# Tiling helper
# --------------------------------------------------------------------------- #
def _pick_tile(dim, pref, quantum):
    """Largest multiple of `quantum` that divides `dim` and is <= `pref`.
    Returns the full dimension when dim <= pref or dim is not quantum-aligned
    (a full-extent block always satisfies the TPU (8,128) block rule)."""
    if dim <= pref or dim % quantum != 0:
        return dim
    t = max(quantum, (min(pref, dim) // quantum) * quantum)
    while dim % t != 0:
        t -= quantum
    return t


# --------------------------------------------------------------------------- #
# Path A: small channel count -> VPU multiply-accumulate (no MXU padding waste)
# --------------------------------------------------------------------------- #
def _eeb_vpu_kernel(w_ref, b_ref, x_ref, o_ref, *, cin, cout):
    # x_ref : (1, Cin, TR, C) VMEM block (input dtype), C = 128 when possible.
    # w_ref : (Cout, Cin) f32 SMEM, b_ref : (Cout,) f32 SMEM.
    # o_ref : (1, Cout, TR, C) VMEM block (input dtype).
    # Per-channel load + per-channel store keeps live ranges to ~one (TR, C)
    # accumulator; f32 scalars promote the MAC to f32 on all generations.
    for co in range(cout):
        acc = x_ref[0, 0] * w_ref[co, 0]
        for ci in range(1, cin):
            acc = acc + x_ref[0, ci] * w_ref[co, ci]
        o_ref[0, co] = (acc + b_ref[co]).astype(o_ref.dtype)


def _conv1x1_vpu(x, w_eff, b_eff):
    N, Cin, H, W = x.shape
    Cout = int(b_eff.shape[0])
    HW = H * W
    in_item = x.dtype.itemsize

    # Lane-dense view: 128 lanes on the last axis whenever H*W allows it so
    # every store is a full (unmasked) vst; otherwise keep NCHW (W on lanes).
    if HW % 128 == 0:
        R, C = HW // 128, 128
        xv = x.reshape(N, Cin, R, C)
    else:
        R, C = H, W
        xv = x

    # Sublane tile from a ~2 MiB-per-buffer VMEM budget (input and output
    # blocks are each double-buffered by the pipeline).
    budget = 2 * 1024 * 1024
    tr_budget = max(8, budget // (max(Cin, Cout) * C * in_item))
    TR = _pick_tile(R, min(1024, int(tr_budget)), 8)
    # v7x megacore: expose >= 2 grid iterations so both TensorCores get work.
    if N == 1 and TR == R and R % 16 == 0:
        TR = R // 2

    vmem_est = 2 * (Cin + Cout) * TR * C * in_item + (2 << 20)
    kernel = functools.partial(_eeb_vpu_kernel, cin=Cin, cout=Cout)
    out = pl.pallas_call(
        kernel,
        out_shape=jax.ShapeDtypeStruct((N, Cout, R, C), x.dtype),
        grid=(N, R // TR),
        in_specs=[
            pl.BlockSpec(memory_space=pltpu.MemorySpace.SMEM),   # weights (Cout, Cin)
            pl.BlockSpec(memory_space=pltpu.MemorySpace.SMEM),   # bias    (Cout,)
            pl.BlockSpec((1, Cin, TR, C), lambda n, s: (n, 0, s, 0)),
        ],
        out_specs=pl.BlockSpec((1, Cout, TR, C), lambda n, s: (n, 0, s, 0)),
        compiler_params=pltpu.CompilerParams(
            dimension_semantics=("parallel", "parallel"),
            vmem_limit_bytes=int(min(48 << 20, max(8 << 20, vmem_est)))),
    )(w_eff.astype(jnp.float32), b_eff.astype(jnp.float32), xv)
    return out.reshape(N, Cout, H, W)


# --------------------------------------------------------------------------- #
# Path B: wide channel count -> tiled MXU matmul
#   out[n, :, hw] = Weff (Cout, Cin) @ x[n, :, hw]    (H*W flattened onto lanes)
# --------------------------------------------------------------------------- #
def _eeb_mxu_kernel(w_ref, b_ref, x_ref, o_ref):
    # Single-K variant: full Cin in one block, no accumulator scratch.
    x = x_ref[0]
    if x.dtype != w_ref.dtype:
        x = x.astype(w_ref.dtype)                     # in-kernel cast (hidden under DMA)
    y = jnp.dot(w_ref[...], x, preferred_element_type=jnp.float32)
    o_ref[0] = (y + b_ref[...]).astype(o_ref.dtype)


def _eeb_mxu_ktiled_kernel(w_ref, b_ref, x_ref, o_ref, acc_ref):
    # Fallback for very large Cin: classic K-innermost accumulator pattern.
    @pl.when(pl.program_id(3) == 0)
    def _init():
        acc_ref[...] = jnp.zeros_like(acc_ref)

    x = x_ref[0]
    if x.dtype != w_ref.dtype:
        x = x.astype(w_ref.dtype)
    acc_ref[...] += jnp.dot(w_ref[...], x, preferred_element_type=jnp.float32)

    @pl.when(pl.program_id(3) == pl.num_programs(3) - 1)
    def _finalize():
        o_ref[0] = (acc_ref[...] + b_ref[...]).astype(o_ref.dtype)


def _conv1x1_mxu(x, w_eff, b_eff, *, compute_dtype=None):
    N, Cin, H, W = x.shape
    Cout = int(b_eff.shape[0])
    HW = H * W
    x2 = x.reshape(N, Cin, HW)                        # contiguous, lane-dense view
    out_dtype = x.dtype
    if compute_dtype is None:
        # bf16 inputs feed the MXU in bf16 (no extra precision loss); f32
        # inputs keep the accurate f32 MXU path (op is memory-bound anyway).
        compute_dtype = jnp.bfloat16 if x.dtype == jnp.bfloat16 else jnp.float32
    wq = w_eff.astype(compute_dtype)                  # tiny one-time weight cast
    b2 = b_eff.reshape(Cout, 1).astype(jnp.float32)
    in_item = x.dtype.itemsize
    out_item = jnp.dtype(out_dtype).itemsize
    w_item = jnp.dtype(compute_dtype).itemsize

    tm_quant = 128 if Cout % 128 == 0 else 8
    TM = _pick_tile(Cout, 256, tm_quant)              # 256 rows feeds v6e/v7x MXU fully

    tn_quant = 256 if HW % 256 == 0 else 128
    budget = 24 * 1024 * 1024                         # double-buffered act + out blocks
    per_lane = 2 * (Cin * in_item + TM * out_item)
    tn_pref = max(tn_quant, min(4096, budget // per_lane))
    TN = _pick_tile(HW, int(tn_pref), tn_quant)
    if N == 1 and TM == Cout and TN == HW and HW % (2 * tn_quant) == 0:
        TN = HW // 2                                  # >=2 parallel steps for v7x 2-TC

    vmem_est = (2 * (Cin * TN * in_item + TM * TN * out_item)
                + 2 * TM * Cin * w_item + TM * TN * 4 + (2 << 20))
    vmem_limit = int(min(48 << 20, max(16 << 20, vmem_est)))

    single_k = (Cin * TN * in_item <= 8 * 1024 * 1024) or (Cin % 128 != 0)
    if single_k:
        out = pl.pallas_call(
            _eeb_mxu_kernel,
            out_shape=jax.ShapeDtypeStruct((N, Cout, HW), out_dtype),
            grid=(N, Cout // TM, HW // TN),
            in_specs=[
                pl.BlockSpec((TM, Cin), lambda n, m, s: (m, 0)),   # weights (constant over s)
                pl.BlockSpec((TM, 1), lambda n, m, s: (m, 0)),     # folded bias
                pl.BlockSpec((1, Cin, TN), lambda n, m, s: (n, 0, s)),
            ],
            out_specs=pl.BlockSpec((1, TM, TN), lambda n, m, s: (n, m, s)),
            compiler_params=pltpu.CompilerParams(
                dimension_semantics=("parallel", "parallel", "parallel"),
                vmem_limit_bytes=vmem_limit),
        )(wq, b2, x2)
    else:
        TK = _pick_tile(Cin, 1024, 128)
        out = pl.pallas_call(
            _eeb_mxu_ktiled_kernel,
            out_shape=jax.ShapeDtypeStruct((N, Cout, HW), out_dtype),
            grid=(N, Cout // TM, HW // TN, Cin // TK),
            in_specs=[
                pl.BlockSpec((TM, TK), lambda n, m, s, k: (m, k)),
                pl.BlockSpec((TM, 1), lambda n, m, s, k: (m, 0)),
                pl.BlockSpec((1, TK, TN), lambda n, m, s, k: (n, k, s)),
            ],
            out_specs=pl.BlockSpec((1, TM, TN), lambda n, m, s, k: (n, m, s)),
            scratch_shapes=[pltpu.VMEM((TM, TN), jnp.float32)],
            compiler_params=pltpu.CompilerParams(
                dimension_semantics=("parallel", "parallel", "parallel", "arbitrary"),
                vmem_limit_bytes=vmem_limit),
        )(wq, b2, x2)
    return out.reshape(N, Cout, H, W)


# --------------------------------------------------------------------------- #
# EEB forward
# --------------------------------------------------------------------------- #
_VPU_CHANNEL_THRESHOLD = 16     # re-tuned down from 32 (VALU-bound above ~16)


def eeb_forward(params, x, r=1.0, bia=0.0, *, mxu_compute_dtype=None):
    """EEB forward: conv1x1(x) * r + bia, with r/bia folded into the conv."""
    w = params["w"]                                   # (Cout, Cin, 1, 1), torch OIHW
    b = params["b"]                                   # (Cout,)
    w_eff = w[:, :, 0, 0].astype(jnp.float32) * r     # fold post-conv scale
    b_eff = b.astype(jnp.float32) * r + bia           # fold post-conv shift
    cout, cin = w_eff.shape
    if max(cin, cout) <= _VPU_CHANNEL_THRESHOLD:
        return _conv1x1_vpu(x, w_eff, b_eff)
    return _conv1x1_mxu(x, w_eff, b_eff, compute_dtype=mxu_compute_dtype)


def eeb_reference(params, x, r=1.0, bia=0.0):
    """Plain-JAX reference (f32-accurate)."""
    w = params["w"][:, :, 0, 0]
    b = params["b"]
    y = jnp.einsum("oc,nchw->nohw", w.astype(jnp.float32), x.astype(jnp.float32),
                   precision=jax.lax.Precision.HIGHEST)
    return (y + b[None, :, None, None]) * r + bia


def init_eeb(key, chann):
    """Matches torch.nn.Conv2d(chann, chann, 1) default init (U(+-1/sqrt(fan_in)))."""
    kw, kb = jax.random.split(key)
    bound = 1.0 / float(chann) ** 0.5
    return {
        "w": jax.random.uniform(kw, (chann, chann, 1, 1), jnp.float32, -bound, bound),
        "b": jax.random.uniform(kb, (chann,), jnp.float32, -bound, bound),
    }


# --------------------------------------------------------------------------- #
if __name__ == "__main__":
    root = jax.random.PRNGKey(0)
    k_ws, k_xs, k_ww, k_xw = jax.random.split(root, 4)

    # ---- small-channel config (module-like, chann=4): lane-dense VPU path ---
    chann = 4
    params_s = init_eeb(k_ws, chann)
    x_s = jax.random.normal(k_xs, (2, chann, 16, 16), jnp.float32)    # NCHW
    out_s = jax.block_until_ready(eeb_forward(params_s, x_s, r=1.0, bia=0.0))
    ref_s = eeb_reference(params_s, x_s)
    assert out_s.shape == (2, chann, 16, 16), out_s.shape
    assert out_s.dtype == x_s.dtype
    assert bool(jnp.all(jnp.isfinite(out_s)))
    assert bool(jnp.allclose(out_s, ref_s, rtol=1e-4, atol=1e-4))

    # ---- wide-channel config: single-K MXU path (f32 in -> f32 compute) -----
    chann_w = 256
    params_w = init_eeb(k_ww, chann_w)
    x_w = jax.random.normal(k_xw, (2, chann_w, 16, 16), jnp.float32)
    out_w = jax.block_until_ready(eeb_forward(params_w, x_w, r=1.0, bia=0.0))
    ref_w = eeb_reference(params_w, x_w)
    assert out_w.shape == (2, chann_w, 16, 16), out_w.shape
    assert out_w.dtype == x_w.dtype
    assert bool(jnp.all(jnp.isfinite(out_w)))
    assert bool(jnp.allclose(out_w, ref_w, rtol=2e-2, atol=2e-2))

    # ---- bf16 activations: bf16 in -> bf16 MXU feed, f32 acc, bf16 out ------
    x_b = x_w.astype(jnp.bfloat16)
    out_b = jax.block_until_ready(eeb_forward(params_w, x_b))
    assert out_b.dtype == jnp.bfloat16
    assert bool(jnp.allclose(out_b.astype(jnp.float32), ref_w, rtol=5e-2, atol=5e-2))

    print("KERNEL_OK")
</pallas_src>

<mosaic_0001>
module attributes {stable_mosaic.version = 11 : i64} {
  func.func @_eeb_vpu_kernel(%arg0: i32, %arg1: i32, %arg2: memref<4x4xf32, #tpu.memory_space<smem>>, %arg3: memref<4xf32, #tpu.memory_space<smem>>, %arg4: memref<1x4x2x128xf32, #tpu.memory_space<vmem>>, %arg5: memref<1x4x2x128xf32, #tpu.memory_space<vmem>>) attributes {dimension_semantics = [#tpu.dimension_semantics<parallel>, #tpu.dimension_semantics<parallel>], iteration_bounds = array<i64: 2, 1>, scalar_prefetch = 0 : i64, scratch_operands = 0 : i64, tpu.core_type = #tpu.core_type<tc>, window_params = [{transform_indices = @transform_0, window_bounds = array<i64: 4, 4>}, {transform_indices = @transform_1, window_bounds = array<i64: 4>}, {transform_indices = @transform_2, window_bounds = array<i64: 1, 4, 2, 128>}, {transform_indices = @transform_3, window_bounds = array<i64: 1, 4, 2, 128>}]} {
    %c0 = arith.constant 0 : index
    %c0_0 = arith.constant 0 : index
    %c0_1 = arith.constant 0 : index
    %c0_2 = arith.constant 0 : index
    %0 = vector.load %arg4[%c0, %c0_0, %c0_1, %c0_2] : memref<1x4x2x128xf32, #tpu.memory_space<vmem>>, vector<1x1x2x128xf32>
    %1 = vector.shape_cast %0 : vector<1x1x2x128xf32> to vector<2x128xf32>
    %c0_3 = arith.constant 0 : index
    %c0_4 = arith.constant 0 : index
    %2 = memref.load %arg2[%c0_3, %c0_4] : memref<4x4xf32, #tpu.memory_space<smem>>
    %3 = vector.broadcast %2 : f32 to vector<2x128xf32>
    %4 = arith.mulf %1, %3 : vector<2x128xf32>
    %c0_5 = arith.constant 0 : index
    %c1 = arith.constant 1 : index
    %c0_6 = arith.constant 0 : index
    %c0_7 = arith.constant 0 : index
    %5 = vector.load %arg4[%c0_5, %c1, %c0_6, %c0_7] : memref<1x4x2x128xf32, #tpu.memory_space<vmem>>, vector<1x1x2x128xf32>
    %6 = vector.shape_cast %5 : vector<1x1x2x128xf32> to vector<2x128xf32>
    %c0_8 = arith.constant 0 : index
    %c1_9 = arith.constant 1 : index
    %7 = memref.load %arg2[%c0_8, %c1_9] : memref<4x4xf32, #tpu.memory_space<smem>>
    %8 = vector.broadcast %7 : f32 to vector<2x128xf32>
    %9 = arith.mulf %6, %8 : vector<2x128xf32>
    %10 = arith.addf %4, %9 : vector<2x128xf32>
    %c0_10 = arith.constant 0 : index
    %c2 = arith.constant 2 : index
    %c0_11 = arith.constant 0 : index
    %c0_12 = arith.constant 0 : index
    %11 = vector.load %arg4[%c0_10, %c2, %c0_11, %c0_12] : memref<1x4x2x128xf32, #tpu.memory_space<vmem>>, vector<1x1x2x128xf32>
    %12 = vector.shape_cast %11 : vector<1x1x2x128xf32> to vector<2x128xf32>
    %c0_13 = arith.constant 0 : index
    %c2_14 = arith.constant 2 : index
    %13 = memref.load %arg2[%c0_13, %c2_14] : memref<4x4xf32, #tpu.memory_space<smem>>
    %14 = vector.broadcast %13 : f32 to vector<2x128xf32>
    %15 = arith.mulf %12, %14 : vector<2x128xf32>
    %16 = arith.addf %10, %15 : vector<2x128xf32>
    %c0_15 = arith.constant 0 : index
    %c3 = arith.constant 3 : index
    %c0_16 = arith.constant 0 : index
    %c0_17 = arith.constant 0 : index
    %17 = vector.load %arg4[%c0_15, %c3, %c0_16, %c0_17] : memref<1x4x2x128xf32, #tpu.memory_space<vmem>>, vector<1x1x2x128xf32>
    %18 = vector.shape_cast %17 : vector<1x1x2x128xf32> to vector<2x128xf32>
    %c0_18 = arith.constant 0 : index
    %c3_19 = arith.constant 3 : index
    %19 = memref.load %arg2[%c0_18, %c3_19] : memref<4x4xf32, #tpu.memory_space<smem>>
    %20 = vector.broadcast %19 : f32 to vector<2x128xf32>
    %21 = arith.mulf %18, %20 : vector<2x128xf32>
    %22 = arith.addf %16, %21 : vector<2x128xf32>
    %c0_20 = arith.constant 0 : index
    %23 = memref.load %arg3[%c0_20] : memref<4xf32, #tpu.memory_space<smem>>
    %24 = vector.broadcast %23 : f32 to vector<2x128xf32>
    %25 = arith.addf %22, %24 : vector<2x128xf32>
    %c0_21 = arith.constant 0 : index
    %c0_22 = arith.constant 0 : index
    %c0_23 = arith.constant 0 : index
    %c0_24 = arith.constant 0 : index
    %26 = vector.load %arg5[%c0_21, %c0_22, %c0_23, %c0_24] : memref<1x4x2x128xf32, #tpu.memory_space<vmem>>, vector<1x1x2x128xf32>
    %27 = vector.shape_cast %26 : vector<1x1x2x128xf32> to vector<2x128xf32>
    %28 = vector.shape_cast %25 : vector<2x128xf32> to vector<1x1x2x128xf32>
    tpu.vector_store %arg5[%c0_21, %c0_22, %c0_23, %c0_24], %28 {strides = array<i32>} : memref<1x4x2x128xf32, #tpu.memory_space<vmem>>, vector<1x1x2x128xf32>,
    %c0_25 = arith.constant 0 : index
    %c0_26 = arith.constant 0 : index
    %c0_27 = arith.constant 0 : index
    %c0_28 = arith.constant 0 : index
    %29 = vector.load %arg4[%c0_25, %c0_26, %c0_27, %c0_28] : memref<1x4x2x128xf32, #tpu.memory_space<vmem>>, vector<1x1x2x128xf32>
    %30 = vector.shape_cast %29 : vector<1x1x2x128xf32> to vector<2x128xf32>
    %c1_29 = arith.constant 1 : index
    %c0_30 = arith.constant 0 : index
    %31 = memref.load %arg2[%c1_29, %c0_30] : memref<4x4xf32, #tpu.memory_space<smem>>
    %32 = vector.broadcast %31 : f32 to vector<2x128xf32>
    %33 = arith.mulf %30, %32 : vector<2x128xf32>
    %c0_31 = arith.constant 0 : index
    %c1_32 = arith.constant 1 : index
    %c0_33 = arith.constant 0 : index
    %c0_34 = arith.constant 0 : index
    %34 = vector.load %arg4[%c0_31, %c1_32, %c0_33, %c0_34] : memref<1x4x2x128xf32, #tpu.memory_space<vmem>>, vector<1x1x2x128xf32>
    %35 = vector.shape_cast %34 : vector<1x1x2x128xf32> to vector<2x128xf32>
    %c1_35 = arith.constant 1 : index
    %c1_36 = arith.constant 1 : index
    %36 = memref.load %arg2[%c1_35, %c1_36] : memref<4x4xf32, #tpu.memory_space<smem>>
    %37 = vector.broadcast %36 : f32 to vector<2x128xf32>
    %38 = arith.mulf %35, %37 : vector<2x128xf32>
    %39 = arith.addf %33, %38 : vector<2x128xf32>
    %c0_37 = arith.constant 0 : index
    %c2_38 = arith.constant 2 : index
    %c0_39 = arith.constant 0 : index
    %c0_40 = arith.constant 0 : index
    %40 = vector.load %arg4[%c0_37, %c2_38, %c0_39, %c0_40] : memref<1x4x2x128xf32, #tpu.memory_space<vmem>>, vector<1x1x2x128xf32>
    %41 = vector.shape_cast %40 : vector<1x1x2x128xf32> to vector<2x128xf32>
    %c1_41 = arith.constant 1 : index
    %c2_42 = arith.constant 2 : index
    %42 = memref.load %arg2[%c1_41, %c2_42] : memref<4x4xf32, #tpu.memory_space<smem>>
    %43 = vector.broadcast %42 : f32 to vector<2x128xf32>
    %44 = arith.mulf %41, %43 : vector<2x128xf32>
    %45 = arith.addf %39, %44 : vector<2x128xf32>
    %c0_43 = arith.constant 0 : index
    %c3_44 = arith.constant 3 : index
    %c0_45 = arith.constant 0 : index
    %c0_46 = arith.constant 0 : index
    %46 = vector.load %arg4[%c0_43, %c3_44, %c0_45, %c0_46] : memref<1x4x2x128xf32, #tpu.memory_space<vmem>>, vector<1x1x2x128xf32>
    %47 = vector.shape_cast %46 : vector<1x1x2x128xf32> to vector<2x128xf32>
    %c1_47 = arith.constant 1 : index
    %c3_48 = arith.constant 3 : index
    %48 = memref.load %arg2[%c1_47, %c3_48] : memref<4x4xf32, #tpu.memory_space<smem>>
    %49 = vector.broadcast %48 : f32 to vector<2x128xf32>
    %50 = arith.mulf %47, %49 : vector<2x128xf32>
    %51 = arith.addf %45, %50 : vector<2x128xf32>
    %c1_49 = arith.constant 1 : index
    %52 = memref.load %arg3[%c1_49] : memref<4xf32, #tpu.memory_space<smem>>
    %53 = vector.broadcast %52 : f32 to vector<2x128xf32>
    %54 = arith.addf %51, %53 : vector<2x128xf32>
    %c0_50 = arith.constant 0 : index
    %c1_51 = arith.constant 1 : index
    %c0_52 = arith.constant 0 : index
    %c0_53 = arith.constant 0 : index
    %55 = vector.load %arg5[%c0_50, %c1_51, %c0_52, %c0_53] : memref<1x4x2x128xf32, #tpu.memory_space<vmem>>, vector<1x1x2x128xf32>
    %56 = vector.shape_cast %55 : vector<1x1x2x128xf32> to vector<2x128xf32>
    %57 = vector.shape_cast %54 : vector<2x128xf32> to vector<1x1x2x128xf32>
    tpu.vector_store %arg5[%c0_50, %c1_51, %c0_52, %c0_53], %57 {strides = array<i32>} : memref<1x4x2x128xf32, #tpu.memory_space<vmem>>, vector<1x1x2x128xf32>,
    %c0_54 = arith.constant 0 : index
    %c0_55 = arith.constant 0 : index
    %c0_56 = arith.constant 0 : index
    %c0_57 = arith.constant 0 : index
    %58 = vector.load %arg4[%c0_54, %c0_55, %c0_56, %c0_57] : memref<1x4x2x128xf32, #tpu.memory_space<vmem>>, vector<1x1x2x128xf32>
    %59 = vector.shape_cast %58 : vector<1x1x2x128xf32> to vector<2x128xf32>
    %c2_58 = arith.constant 2 : index
    %c0_59 = arith.constant 0 : index
    %60 = memref.load %arg2[%c2_58, %c0_59] : memref<4x4xf32, #tpu.memory_space<smem>>
    %61 = vector.broadcast %60 : f32 to vector<2x128xf32>
    %62 = arith.mulf %59, %61 : vector<2x128xf32>
    %c0_60 = arith.constant 0 : index
    %c1_61 = arith.constant 1 : index
    %c0_62 = arith.constant 0 : index
    %c0_63 = arith.constant 0 : index
    %63 = vector.load %arg4[%c0_60, %c1_61, %c0_62, %c0_63] : memref<1x4x2x128xf32, #tpu.memory_space<vmem>>, vector<1x1x2x128xf32>
    %64 = vector.shape_cast %63 : vector<1x1x2x128xf32> to vector<2x128xf32>
    %c2_64 = arith.constant 2 : index
    %c1_65 = arith.constant 1 : index
    %65 = memref.load %arg2[%c2_64, %c1_65] : memref<4x4xf32, #tpu.memory_space<smem>>
    %66 = vector.broadcast %65 : f32 to vector<2x128xf32>
    %67 = arith.mulf %64, %66 : vector<2x128xf32>
    %68 = arith.addf %62, %67 : vector<2x128xf32>
    %c0_66 = arith.constant 0 : index
    %c2_67 = arith.constant 2 : index
    %c0_68 = arith.constant 0 : index
    %c0_69 = arith.constant 0 : index
    %69 = vector.load %arg4[%c0_66, %c2_67, %c0_68, %c0_69] : memref<1x4x2x128xf32, #tpu.memory_space<vmem>>, vector<1x1x2x128xf32>
    %70 = vector.shape_cast %69 : vector<1x1x2x128xf32> to vector<2x128xf32>
    %c2_70 = arith.constant 2 : index
    %c2_71 = arith.constant 2 : index
    %71 = memref.load %arg2[%c2_70, %c2_71] : memref<4x4xf32, #tpu.memory_space<smem>>
    %72 = vector.broadcast %71 : f32 to vector<2x128xf32>
    %73 = arith.mulf %70, %72 : vector<2x128xf32>
    %74 = arith.addf %68, %73 : vector<2x128xf32>
    %c0_72 = arith.constant 0 : index
    %c3_73 = arith.constant 3 : index
    %c0_74 = arith.constant 0 : index
    %c0_75 = arith.constant 0 : index
    %75 = vector.load %arg4[%c0_72, %c3_73, %c0_74, %c0_75] : memref<1x4x2x128xf32, #tpu.memory_space<vmem>>, vector<1x1x2x128xf32>
    %76 = vector.shape_cast %75 : vector<1x1x2x128xf32> to vector<2x128xf32>
    %c2_76 = arith.constant 2 : index
    %c3_77 = arith.constant 3 : index
    %77 = memref.load %arg2[%c2_76, %c3_77] : memref<4x4xf32, #tpu.memory_space<smem>>
    %78 = vector.broadcast %77 : f32 to vector<2x128xf32>
    %79 = arith.mulf %76, %78 : vector<2x128xf32>
    %80 = arith.addf %74, %79 : vector<2x128xf32>
    %c2_78 = arith.constant 2 : index
    %81 = memref.load %arg3[%c2_78] : memref<4xf32, #tpu.memory_space<smem>>
    %82 = vector.broadcast %81 : f32 to vector<2x128xf32>
    %83 = arith.addf %80, %82 : vector<2x128xf32>
    %c0_79 = arith.constant 0 : index
    %c2_80 = arith.constant 2 : index
    %c0_81 = arith.constant 0 : index
    %c0_82 = arith.constant 0 : index
    %84 = vector.load %arg5[%c0_79, %c2_80, %c0_81, %c0_82] : memref<1x4x2x128xf32, #tpu.memory_space<vmem>>, vector<1x1x2x128xf32>
    %85 = vector.shape_cast %84 : vector<1x1x2x128xf32> to vector<2x128xf32>
    %86 = vector.shape_cast %83 : vector<2x128xf32> to vector<1x1x2x128xf32>
    tpu.vector_store %arg5[%c0_79, %c2_80, %c0_81, %c0_82], %86 {strides = array<i32>} : memref<1x4x2x128xf32, #tpu.memory_space<vmem>>, vector<1x1x2x128xf32>,
    %c0_83 = arith.constant 0 : index
    %c0_84 = arith.constant 0 : index
    %c0_85 = arith.constant 0 : index
    %c0_86 = arith.constant 0 : index
    %87 = vector.load %arg4[%c0_83, %c0_84, %c0_85, %c0_86] : memref<1x4x2x128xf32, #tpu.memory_space<vmem>>, vector<1x1x2x128xf32>
    %88 = vector.shape_cast %87 : vector<1x1x2x128xf32> to vector<2x128xf32>
    %c3_87 = arith.constant 3 : index
    %c0_88 = arith.constant 0 : index
    %89 = memref.load %arg2[%c3_87, %c0_88] : memref<4x4xf32, #tpu.memory_space<smem>>
    %90 = vector.broadcast %89 : f32 to vector<2x128xf32>
    %91 = arith.mulf %88, %90 : vector<2x128xf32>
    %c0_89 = arith.constant 0 : index
    %c1_90 = arith.constant 1 : index
    %c0_91 = arith.constant 0 : index
    %c0_92 = arith.constant 0 : index
    %92 = vector.load %arg4[%c0_89, %c1_90, %c0_91, %c0_92] : memref<1x4x2x128xf32, #tpu.memory_space<vmem>>, vector<1x1x2x128xf32>
    %93 = vector.shape_cast %92 : vector<1x1x2x128xf32> to vector<2x128xf32>
    %c3_93 = arith.constant 3 : index
    %c1_94 = arith.constant 1 : index
    %94 = memref.load %arg2[%c3_93, %c1_94] : memref<4x4xf32, #tpu.memory_space<smem>>
    %95 = vector.broadcast %94 : f32 to vector<2x128xf32>
    %96 = arith.mulf %93, %95 : vector<2x128xf32>
    %97 = arith.addf %91, %96 : vector<2x128xf32>
    %c0_95 = arith.constant 0 : index
    %c2_96 = arith.constant 2 : index
    %c0_97 = arith.constant 0 : index
    %c0_98 = arith.constant 0 : index
    %98 = vector.load %arg4[%c0_95, %c2_96, %c0_97, %c0_98] : memref<1x4x2x128xf32, #tpu.memory_space<vmem>>, vector<1x1x2x128xf32>
    %99 = vector.shape_cast %98 : vector<1x1x2x128xf32> to vector<2x128xf32>
    %c3_99 = arith.constant 3 : index
    %c2_100 = arith.constant 2 : index
    %100 = memref.load %arg2[%c3_99, %c2_100] : memref<4x4xf32, #tpu.memory_space<smem>>
    %101 = vector.broadcast %100 : f32 to vector<2x128xf32>
    %102 = arith.mulf %99, %101 : vector<2x128xf32>
    %103 = arith.addf %97, %102 : vector<2x128xf32>
    %c0_101 = arith.constant 0 : index
    %c3_102 = arith.constant 3 : index
    %c0_103 = arith.constant 0 : index
    %c0_104 = arith.constant 0 : index
    %104 = vector.load %arg4[%c0_101, %c3_102, %c0_103, %c0_104] : memref<1x4x2x128xf32, #tpu.memory_space<vmem>>, vector<1x1x2x128xf32>
    %105 = vector.shape_cast %104 : vector<1x1x2x128xf32> to vector<2x128xf32>
    %c3_105 = arith.constant 3 : index
    %c3_106 = arith.constant 3 : index
    %106 = memref.load %arg2[%c3_105, %c3_106] : memref<4x4xf32, #tpu.memory_space<smem>>
    %107 = vector.broadcast %106 : f32 to vector<2x128xf32>
    %108 = arith.mulf %105, %107 : vector<2x128xf32>
    %109 = arith.addf %103, %108 : vector<2x128xf32>
    %c3_107 = arith.constant 3 : index
    %110 = memref.load %arg3[%c3_107] : memref<4xf32, #tpu.memory_space<smem>>
    %111 = vector.broadcast %110 : f32 to vector<2x128xf32>
    %112 = arith.addf %109, %111 : vector<2x128xf32>
    %c0_108 = arith.constant 0 : index
    %c3_109 = arith.constant 3 : index
    %c0_110 = arith.constant 0 : index
    %c0_111 = arith.constant 0 : index
    %113 = vector.load %arg5[%c0_108, %c3_109, %c0_110, %c0_111] : memref<1x4x2x128xf32, #tpu.memory_space<vmem>>, vector<1x1x2x128xf32>
    %114 = vector.shape_cast %113 : vector<1x1x2x128xf32> to vector<2x128xf32>
    %115 = vector.shape_cast %112 : vector<2x128xf32> to vector<1x1x2x128xf32>
    tpu.vector_store %arg5[%c0_108, %c3_109, %c0_110, %c0_111], %115 {strides = array<i32>} : memref<1x4x2x128xf32, #tpu.memory_space<vmem>>, vector<1x1x2x128xf32>,
    return
  }
  func.func @transform_0(%arg0: i32, %arg1: i32) -> (i32, i32) {
    %c0_i32 = arith.constant 0 : i32
    %c0_i32_0 = arith.constant 0 : i32
    %c0_i32_1 = arith.constant 0 : i32
    return %c0_i32, %c0_i32_0 : i32, i32
  }
  func.func @transform_1(%arg0: i32, %arg1: i32) -> i32 {
    %c0_i32 = arith.constant 0 : i32
    %c0_i32_0 = arith.constant 0 : i32
    return %c0_i32 : i32
  }
  func.func @transform_2(%arg0: i32, %arg1: i32) -> (i32, i32, i32, i32) {
    %c0_i32 = arith.constant 0 : i32
    %c0_i32_0 = arith.constant 0 : i32
    %c0_i32_1 = arith.constant 0 : i32
    return %arg0, %c0_i32, %arg1, %c0_i32_0 : i32, i32, i32, i32
  }
  func.func @transform_3(%arg0: i32, %arg1: i32) -> (i32, i32, i32, i32) {
    %c0_i32 = arith.constant 0 : i32
    %c0_i32_0 = arith.constant 0 : i32
    %c0_i32_1 = arith.constant 0 : i32
    return %arg0, %c0_i32, %arg1, %c0_i32_0 : i32, i32, i32, i32
  }
}

</mosaic_0001>

<bundles_post_ra>
// kernel: tpu_custom_call.1
= control target key start
LH: loop header
LB: loop body
LE: loop exit
PB: predicated region body
PF: predicated region fallthrough
CT: control target
= control target key end

     0   :  { %s987_s0 = inlined_call_operand.hbm [shape: f32[4,4], index: 0, kind: input, shape index: {}]   ;;  %s988_s1 = inlined_call_operand.vmem [shape: f32[4], index: 1, kind: input, shape index: {}]   ;;  %s989_s2 = inlined_call_operand.hbm [shape: f32[2,4,2,128], index: 2, kind: input, shape index: {}]   ;;  %s990_s3 = inlined_call_operand.hbm [shape: f32[2,4,2,128], index: 3, kind: output, shape index: {}]  }
   0x1   :  { %992 = sst [smem:[#allocation14_spill]] %s987_s0 }
   0x2   :  { %8 = vsyncpa [#allocation5], 0 }
   0x3   :  { %9 = vsyncpa [#allocation6], 0 }
   0x4   :  { %10 = vsyncpa [#allocation3], 0 }
   0x5   :  { %12 = vsyncpa [#allocation3 + $0x1], 0 }
   0x6   :  { %13 = vsyncpa [#allocation4], 0 }
   0x7   :  { %15 = vsyncpa [#allocation4 + $0x1], 0  ;;  %s766_s12 = smov 0   ;;  %s768_s13 = smov 0  }
   0x8   :  { %s770_s14 = smov 0   ;;  %s772_s15 = smov 0  }
   0x9   :  { %s774_s16 = smov 0   ;;  %s776_s17 = smov 0  }
   0xa LB: > { %s453_s18 = sadd.s32 4294967295, %s736_s17   ;;  %s454_s19 = sadd.s32 4294967294, %s736_s17   ;;  %s736_s17 = sphi %s776_s17, %s21_s17   ;;  %s732_s16 = sphi %s774_s16, %s1008_s16   ;;  %s728_s15 = sphi %s772_s15, %s1007_s15   ;;  %s724_s14 = sphi %s770_s14, %s1006_s14   ;;  %s720_s13 = sphi %s768_s13, %s1005_s13   ;;  %s716_s12 = sphi %s766_s12, %s1004_s12  }
   0xb   : > { %s84_s20 = sadd.s32 1, %s724_s14  ;;  %p91_p0 = scmp.ne.s32.totalorder %s724_s14, %s720_s13 }
   0xc   : > { %p92_p1 = scmp.eq.s32.totalorder %s736_s17, 0  ;;  %p97_p2 = scmp.ne.s32.totalorder %s720_s13, %s716_s12 }
   0xd   : > { %p804_p3 = scmp.eq.s32.totalorder %s453_s18, 0  ;;  %p123_p4 = scmp.eq.s32.totalorder %s453_s18, 1 }
   0xe   : > { %p93_p5 = por %p92_p1, %p91_p0  ;;  %p129_p6 = scmp.eq.s32.totalorder %s454_s19, 1 }
   0xf   : > { %p810_p7 = por %p804_p3, %p97_p2  ;;  %p814_p8 = por %p123_p4, %p91_p0 }
  0x10   : > { %p818_p9 = por %p129_p6, %p97_p2  ;;  %p455_p10 = scmp.ge.s32.totalorder %s736_s17, 1 }
  0x11   : > { %s995_s23 = scalar_select %p814_p8, 1, 0 }
  0x12   : > { %s996_s24 = scalar_select %p818_p9, 1, 0 }
  0x13   : > { %p136_p11 = scmp.lt.s32.totalorder %s736_s17, 3  ;;  %p536_p1 = scmp.lt.s32.totalorder %s736_s17, 2 }
  0x14   : > { %s158_s28 = sshll.u32 %s988_s1, 4  ;;  %s169_s4 = sand.u32 1, %s724_s14   ;;  %s159_s28 = int_to_ptr.vmem [resolvable:$true] %s158_s28 }
  0x15   : > { %p825_p13 = pnand %p455_p10, %p136_p11  ;;  %p835_p4 = pnand %p536_p1, %p93_p5 }
  0x16   : > { %s33_s5 = sadd.s32 1, %s732_s16  ;;  %s738_s6 = smov [#allocation2]  }
  0x17   : > { %p519_p0 = pneg %p825_p13  ;;  %s1000_s0 = sld [smem:[#allocation14_spill]] }
  0x18   : > { %s605_s9 = scalar_lea.vmem %s159_s28, 16  ;;  %p613_p1 = scmp.lt.s32.totalorder %s159_s28, %s159_s28 }
  0x19   : > { %p841_p2 = pnand %p519_p0, %p804_p3  ;;  %p606_p5 = scmp.ne.s32.totalorder %s159_s28, %s605_s9 }
  0x1a   : > { %p614_p0 = scmp.lt.s32.totalorder %s605_s9, %s605_s9 }
  0x1b   : > { %p607_p6 = pneg %p841_p2 }
  0x1c   : > { %p615_p12 = por %p614_p0, %p613_p1 }
  0x1d   : > { %522 = dma.hbm_to_smem (!%p841_p2), %s1000_s0, 64, %s738_s6, [#allocation5]  }
  0x1e   : > { %p608_p10 = pnand %p607_p6, %p606_p5 }
  0x20   : > { %p609_p11 = pneg %p608_p10 }
  0x22   : > { %p616_p9 = pnand %p615_p12, %p609_p11 }
  0x24   : > { %619 = shalt.err (!%p616_p9)
}
  0x25   : > { %s739_s10 = smov [#allocation7]   ;;  %p35_p8 = scmp.ge.s32.totalorder %s33_s5, 2 }
  0x26   : > { %525 = dma.vmem_to_smem (!%p841_p2), %s159_s28, 16, %s739_s10, [#allocation6]  }
  0x27   : > { %s459_s11 = sshll.u32 %s169_s4, 3  ;;  %s505_s18 = sshll.u32 %s732_s16, 7 }
  0x28   : > { %s1010_s5 = smov (%p35_p8, %s33_s5), 0  ;;  %s180_s27 = scalar_lea.hbm %s989_s2, %s505_s18 }
  0x29   : > { %s79_s6 = ssub.s32 %s732_s16, %s1010_s5  ;;  %s173_s7 = scalar_lea.vmem [#allocation8], %s459_s11 }
  0x2a   : > { %s181_s8 = sshll.u32 %s173_s7, 4  ;;  %p82_p9 = scmp.eq.s32.totalorder %s79_s6, 0  ;;  %s182_s8 = int_to_ptr.vmem [resolvable:$true] %s181_s8 }
  0x2b   : > { %s170_s9 = scalar_lea.sflag [#allocation3], %s169_s4  ;;  %p622_p12 = pneg %p835_p4 }
  0x2c   : > { %s867_s30 = scalar_select %p82_p9, %s724_s14, %s84_s20  }
  0x2d   : > { %s633_s28 = scalar_lea.vmem %s182_s8, 128  ;;  %s740_s10 = smov [#allocation8]  }
  0x2e   : > { %p634_p2 = scmp.ne.s32.totalorder %s182_s8, %s633_s28  ;;  %s638_s0 = sshll.u32 %s740_s10, 4  ;;  %s639_s0 = int_to_ptr.vmem [resolvable:$false] %s638_s0 }
  0x2f   : > { %s640_s19 = scalar_lea.vmem %s639_s0, 256  ;;  %p641_p6 = scmp.lt.s32.totalorder %s182_s8, %s639_s0 }
  0x30   : > { %p636_p8 = pnand %p634_p2, %p622_p12  ;;  %p642_p10 = scmp.lt.s32.totalorder %s640_s19, %s633_s28 }
  0x32   : > { %p637_p5 = pneg %p636_p8  ;;  %p643_p11 = por %p642_p10, %p641_p6 }
  0x34   : > { %p644_p1 = pnand %p643_p11, %p637_p5 }
  0x36   : > { %647 = shalt.err (!%p644_p1)
}
  0x37   : > { %s741_s11 = smov 32   ;;  %s742_s20 = smov 2  }
  0x38   : > { %529 = dma.hbm_to_vmem [thread:$0]  (!%p835_p4), %s180_s27, 128, %s182_s8, %s170_s9, %s741_s11, %s741_s11, %s742_s20  }
  0x39   : > { %193 = sbr.rel (%p825_p13) target bundleno = 118 (0x76), region = 32 }
  0x3e   : > { %699 = dma.done.wait (%p804_p3), [#allocation5], 64  }
  0x3f   : > { %701 = vsyncadd (%p804_p3), [#allocation5], 4294967232 }
  0x40   : > { %703 = dma.done.wait (%p804_p3), [#allocation6], 16  }
  0x41   : > { %705 = vsyncadd (%p804_p3), [#allocation6], 4294967280  ;;  %s884_s0 = sand.u32 1, %s720_s13  }
  0x42   : > { %s465_s25 = sshll.u32 %s884_s0, 3  ;;  %s204_s29 = scalar_lea.sflag [#allocation3], %s884_s0 }
  0x43   : > { %s890_s4 = scalar_lea.vmem [#allocation8], %s465_s25 }
  0x44   : > { %707 = dma.done.wait (%p810_p7), %s204_s29, 128  }
  0x45   : > { %709 = vsyncadd (%p810_p7), %s204_s29, 4294967168 }
  0x46   : > { %212 = sfence }
  0x47   : > { %s232_s21 = sld [smem:[#allocation2]]  ;;  %v231_v0 = vld [vmem:[%s890_s4] sm:$0x3]  ;;  %v467_v1 = vld [vmem:[%s890_s4 + $0x2] sm:$0x3]  ;;  %p1001_p7 = scmp.ne.s32.totalorder %s995_s23, 0 }
  0x48   : > { %s468_s18 = sld [smem:[#allocation2 + $0x1]]  ;;  %v469_v3 = vld [vmem:[%s890_s4 + $0x4] sm:$0x3]  ;;  %v471_v6 = vld [vmem:[%s890_s4 + $0x6] sm:$0x3] }
  0x49   : > { %s470_s26 = sld [smem:[#allocation2 + $0x2]]  ;;  %v257_v11 = vld [vmem:[%s890_s4] sm:$0x3]  ;;  %v474_v14 = vld [vmem:[%s890_s4 + $0x2] sm:$0x3] }
  0x4a   : > { %s472_s27 = sld [smem:[#allocation2 + $0x3]]  ;;  %v476_v16 = vld [vmem:[%s890_s4 + $0x4] sm:$0x3]  ;;  %v478_v20 = vld [vmem:[%s890_s4 + $0x6] sm:$0x3] }
  0x4b   : > { %s897_s6 = sld [smem:[#allocation7]]  ;;  %v281_v27 = vld [vmem:[%s890_s4] sm:$0x3]  ;;  %v483_v30 = vld [vmem:[%s890_s4 + $0x2] sm:$0x3] }
  0x4c   : > { %s473_s7 = sld [smem:[#allocation2 + $0x80]]  ;;  %v485_v33 = vld [vmem:[%s890_s4 + $0x4] sm:$0x3]  ;;  %v487_v37 = vld [vmem:[%s890_s4 + $0x6] sm:$0x3] }
  0x4d   : > { %v233_v2 = vstv %s232_s21  ;;  %s475_s22 = sld [smem:[#allocation2 + $0x81]]  ;;  %v305_v44 = vld [vmem:[%s890_s4] sm:$0x3]  ;;  %v492_v47 = vld [vmem:[%s890_s4 + $0x2] sm:$0x3] }
  0x4e   : > { %v234_v4 = vmul.f32 %v233_v2, %v231_v0  ;;  %v238_v5 = vstv %s468_s18  ;;  %s477_s8 = sld [smem:[#allocation2 + $0x82]]  ;;  %v494_v50 = vld [vmem:[%s890_s4 + $0x4] sm:$0x3]  ;;  %v496_v54 = vld [vmem:[%s890_s4 + $0x6] sm:$0x3] }
  0x4f   : > { %v239_v7 = vmul.f32 %v467_v1, %v238_v5  ;;  %v244_v8 = vstv %s470_s26  ;;  %s479_s9 = sld [smem:[#allocation2 + $0x83]] }
  0x50   : > { %v245_v9 = vmul.f32 %v469_v3, %v244_v8  ;;  %v250_v10 = vstv %s472_s27  ;;  %s903_s28 = sld [smem:[#allocation7 + $0x1]]  ;;  %s920_s27 = scalar_lea.vmem [#allocation9], %s465_s25 }
  0x51   : > { %v240_v12 = vadd.f32 %v239_v7, %v234_v4  ;;  %v251_v13 = vmul.f32 %v471_v6, %v250_v10  ;;  %s482_s10 = sld [smem:[#allocation2 + $0x100]]  ;;  %v254_v21 = vstv %s897_s6  ;;  %s344_s25 = sshll.u32 %s920_s27, 4  ;;  %s933_s25 = int_to_ptr.vmem [resolvable:$true] %s344_s25 }
  0x52   : > { %v259_v15 = vstv %s473_s7  ;;  %s907_s19 = sld [smem:[#allocation2 + $0x101]] }
  0x53   : > { %v246_v17 = vadd.f32 %v245_v9, %v240_v12  ;;  %v260_v18 = vmul.f32 %v259_v15, %v257_v11  ;;  %v263_v19 = vstv %s475_s22  ;;  %s486_s11 = sld [smem:[#allocation2 + $0x102]]  ;;  %s506_s22 = sshll.u32 %s728_s15, 7 }
  0x54   : > { %v264_v22 = vmul.f32 %v474_v14, %v263_v19  ;;  %v268_v23 = vstv %s477_s8  ;;  %s488_s20 = sld [smem:[#allocation2 + $0x103]]  ;;  %s743_s15 = smov [#allocation9]  }
  0x55   : > { %v252_v24 = vadd.f32 %v251_v13, %v246_v17  ;;  %v269_v25 = vmul.f32 %v476_v16, %v268_v23  ;;  %v273_v26 = vstv %s479_s9  ;;  %s912_s29 = sld [smem:[#allocation7 + $0x2]]  ;;  %s938_s9 = scalar_lea.hbm %s990_s3, %s506_s22 }
  0x56   : > { %v265_v28 = vadd.f32 %v264_v22, %v260_v18  ;;  %v274_v29 = vmul.f32 %v478_v20, %v273_v26  ;;  %s491_s21 = sld [smem:[#allocation2 + $0x180]]  ;;  %v277_v38 = vstv %s903_s28  ;;  %s330_s28 = scalar_lea.sflag [#allocation4], %s884_s0 }
  0x57   : > { %v255_v31 = vadd.f32 %v254_v21, %v252_v24  ;;  %v283_v32 = vstv %s482_s10  ;;  %s493_s18 = sld [smem:[#allocation2 + $0x181]]  ;;  %s648_s10 = scalar_lea.vmem %s933_s25, 128 }
  0x58   : > { %v270_v34 = vadd.f32 %v269_v25, %v265_v28  ;;  %v284_v35 = vmul.f32 %v283_v32, %v281_v27  ;;  %v287_v36 = vstv %s907_s19  ;;  %s495_s26 = sld [smem:[#allocation2 + $0x182]]  ;;  %p649_p3 = scmp.ne.s32.totalorder %s933_s25, %s648_s10 }
  0x59   : > { %256 = vst [vmem:[%s920_s27] sm:$0x3] %v255_v31  ;;  %v288_v39 = vmul.f32 %v483_v30, %v287_v36  ;;  %v292_v40 = vstv %s486_s11  ;;  %s497_s6 = sld [smem:[#allocation2 + $0x183]]  ;;  %s652_s19 = sshll.u32 %s743_s15, 4  ;;  %s653_s19 = int_to_ptr.vmem [resolvable:$false] %s652_s19 }
  0x5a   : > { %v275_v41 = vadd.f32 %v274_v29, %v270_v34  ;;  %v293_v42 = vmul.f32 %v485_v33, %v292_v40  ;;  %v297_v43 = vstv %s488_s20  ;;  %s498_s7 = sld [smem:[#allocation7 + $0x3]]  ;;  %p650_p13 = pnand %p649_p3, %p1001_p7 }
  0x5b   : > { %v289_v45 = vadd.f32 %v288_v39, %v284_v35  ;;  %v298_v46 = vmul.f32 %v487_v37, %v297_v43  ;;  %v301_v55 = vstv %s912_s29  ;;  %s654_s11 = scalar_lea.vmem %s653_s19, 256  ;;  %p655_p0 = scmp.lt.s32.totalorder %s933_s25, %s653_s19 }
  0x5c   : > { %v278_v48 = vadd.f32 %v277_v38, %v275_v41  ;;  %v307_v49 = vstv %s491_s21  ;;  %p651_p4 = pneg %p650_p13  ;;  %p656_p9 = scmp.lt.s32.totalorder %s654_s11, %s648_s10 }
  0x5d   : > { %v294_v51 = vadd.f32 %v293_v42, %v289_v45  ;;  %v308_v52 = vmul.f32 %v307_v49, %v305_v44  ;;  %v311_v53 = vstv %s493_s18 }
  0x5e   : > { %481 = vst [vmem:[%s920_s27 + $0x2] sm:$0x3] %v278_v48  ;;  %v312_v56 = vmul.f32 %v492_v47, %v311_v53  ;;  %v316_v57 = vstv %s495_s26  ;;  %p657_p12 = por %p656_p9, %p655_p0 }
  0x5f   : > { %v299_v58 = vadd.f32 %v298_v46, %v294_v51  ;;  %v317_v59 = vmul.f32 %v494_v50, %v316_v57  ;;  %v321_v60 = vstv %s497_s6 }
  0x60   : > { %v313_v61 = vadd.f32 %v312_v56, %v308_v52  ;;  %v322_v62 = vmul.f32 %v496_v54, %v321_v60  ;;  %v325_v1 = vstv %s498_s7  ;;  %p658_p2 = pnand %p657_p12, %p651_p4 }
  0x61   : > { %v302_v63 = vadd.f32 %v301_v55, %v299_v58 }
  0x62   : > { %v318_v0 = vadd.f32 %v317_v59, %v313_v61 }
  0x63   : > { %490 = vst [vmem:[%s920_s27 + $0x4] sm:$0x3] %v302_v63 }
  0x64   : > { %v323_v2 = vadd.f32 %v322_v62, %v318_v0 }
  0x66   : > { %v326_v3 = vadd.f32 %v325_v1, %v323_v2 }
  0x68   : > { %499 = vst [vmem:[%s920_s27 + $0x6] sm:$0x3] %v326_v3 }
  0x69   : > { %661 = shalt.err (!%p658_p2)
}
  0x6a   : > { %s662_s20 = scalar_lea.hbm %s938_s9, 128  ;;  %s666_s18 = scalar_lea.hbm %s990_s3, 256 }
  0x6b   : > { %p663_p8 = scmp.ne.s32.totalorder %s938_s9, %s662_s20  ;;  %p667_p10 = scmp.lt.s32.totalorder %s938_s9, %s990_s3 }
  0x6c   : > { %p668_p11 = scmp.lt.s32.totalorder %s666_s18, %s662_s20 }
  0x6d   : > { %p664_p5 = pnand %p663_p8, %p1001_p7 }
  0x6e   : > { %p669_p1 = por %p668_p11, %p667_p10 }
  0x6f   : > { %p665_p6 = pneg %p664_p5 }
  0x71   : > { %p670_p3 = pnand %p669_p1, %p665_p6 }
  0x73   : > { %673 = shalt.err (!%p670_p3)
}
  0x74   : > { %s744_s6 = smov 32   ;;  %s745_s7 = smov 2  }
  0x75   : > { %517 = dma.vmem_to_hbm [thread:$0]  (%p1001_p7), %s933_s25, 128, %s938_s9, %s330_s28, %s744_s6, %s744_s6, %s745_s7  }
  0x76 PF: > { %s359_s22 = sand.u32 1, %s716_s12   ;;  %p1002_p13 = scmp.ne.s32.totalorder %s996_s24, 0 }
  0x77   : > { %p1003_p4 = scmp.ge.s32.totalorder %s736_s17, 2  ;;  %s360_s4 = scalar_lea.sflag [#allocation4], %s359_s22 }
  0x79   : > { %p531_p0 = pnand %p1003_p4, %p1002_p13 }
  0x7b   : > { %p532_p9 = pneg %p531_p0 }
  0x7d   : > { %711 = dma.done.wait (%p532_p9), %s360_s4, 128  }
  0x7e   : > { %713 = vsyncadd (%p532_p9), %s360_s4, 4294967168  ;;  %s21_s17 = sadd.s32 1, %s736_s17   ;;  %s1004_s12 = smov %s720_s13 }
  0x7f   : > { %p18_p12 = scmp.ge.s32.totalorder %s21_s17, 4   ;;  %s1005_s13 = smov %s724_s14 }
  0x80   : > { %s1006_s14 = smov %s867_s30  ;;  %s1007_s15 = smov %s732_s16 }
  0x81   : > { %s1008_s16 = smov %s1010_s5  ;;  %20 = sbr.rel (!%p18_p12) target bundleno = 10 (0xa), region = 93 }
  0x86   :  { %365 = vsyncpa [#allocation3], 1 }
  0x87   :  { %367 = vsyncpa [#allocation3 + $0x1], 1 }
  0x88   :  { %368 = vsyncpa [#allocation4], 1 }
  0x89   :  { %370 = vsyncpa [#allocation4 + $0x1], 1 }
  0x8a   :  { %371 = vsyncpa [#allocation5], 1 }
  0x8b   :  { %373 = vsyncpa [#allocation5 + $0x1], 1 }
  0x8c   :  { %374 = vsyncpa [#allocation6], 1 }
  0x8d   :  { %376 = vsyncpa [#allocation6 + $0x1], 1 }

</bundles_post_ra>
